<compile_context>
chip_gen: v5e
topology: v5e:2x2
jax: 0.10.0
libtpu: 0.0.40
codegen_flags: <defaults>
</compile_context>

<pallas_src>
import functools

import jax
import jax.numpy as jnp
from jax.experimental import pallas as pl
from jax.experimental.pallas import tpu as pltpu


# ---------------------------------------------------------------------------
# Kernel
# ---------------------------------------------------------------------------
def _make_kernel(apply_b, apply_c, apply_s, apply_h):
    """Build a ColorJitter kernel specialized on which stages are active."""

    def kernel(scal_ref, x_ref, o_ref):
        # scal_ref : SMEM (4 + N,) f32 = [bf, cf, sf, hue_shift, mean_0..mean_{N-1}]
        # x_ref/o_ref : (1, 3, TR, 128) tile of one image (lane-dense, full sublanes)
        n = pl.program_id(0)

        r = x_ref[0, 0].astype(jnp.float32)
        g = x_ref[0, 1].astype(jnp.float32)
        b = x_ref[0, 2].astype(jnp.float32)

        if apply_b:  # brightness: blend with zeros, clamp to [0, 1]
            bf = scal_ref[0]
            r = jnp.clip(r * bf, 0.0, 1.0)
            g = jnp.clip(g * bf, 0.0, 1.0)
            b = jnp.clip(b * bf, 0.0, 1.0)

        if apply_c:  # contrast: blend with the (precomputed) per-image gray mean
            cf = scal_ref[1]
            mean = scal_ref[4 + n]
            off = (1.0 - cf) * mean
            r = jnp.clip(cf * r + off, 0.0, 1.0)
            g = jnp.clip(cf * g + off, 0.0, 1.0)
            b = jnp.clip(cf * b + off, 0.0, 1.0)

        if apply_s:  # saturation: blend with the per-pixel grayscale
            sf = scal_ref[2]
            gray = (1.0 - sf) * (0.2989 * r + 0.587 * g + 0.114 * b)
            r = jnp.clip(sf * r + gray, 0.0, 1.0)
            g = jnp.clip(sf * g + gray, 0.0, 1.0)
            b = jnp.clip(sf * b + gray, 0.0, 1.0)

        if apply_h:  # hue: RGB -> HSV, shift hue, closed-form HSV -> RGB
            hf = scal_ref[3]

            maxc = jnp.maximum(jnp.maximum(r, g), b)
            minc = jnp.minimum(jnp.minimum(r, g), b)
            eqc = maxc == minc
            crm = maxc - minc
            ones = jnp.ones_like(maxc)
            # exact reciprocals (not approx) so hue of near-gray pixels matches
            inv_max = 1.0 / jnp.where(eqc, ones, maxc)
            inv_cr = 1.0 / jnp.where(eqc, ones, crm)
            sat = crm * inv_max

            is_r = maxc == r
            is_g = (maxc == g) & jnp.logical_not(is_r)
            diff = jnp.where(is_r, g - b, jnp.where(is_g, b - r, r - g))
            offs = jnp.where(is_r, 0.0, jnp.where(is_g, 2.0, 4.0))
            h6 = diff * inv_cr + offs                 # sextant coordinate in (-1, 5]

            h = h6 * (1.0 / 6.0) + 1.0
            h = h - jnp.floor(h)                      # fmod(., 1.0), arg >= 0
            h = h + hf
            h = h - jnp.floor(h)                      # (h + hue_factor) % 1.0
            h6 = h * 6.0

            v = maxc
            vs = v * sat

            def chan(offset):
                k = offset + h6
                k = jnp.where(k >= 6.0, k - 6.0, k)   # k in [0, 6)
                t = jnp.clip(jnp.minimum(k, 4.0 - k), 0.0, 1.0)
                return v - vs * t

            r, g, b = chan(5.0), chan(3.0), chan(1.0)

        # direct per-channel stores (no concatenate -> no extra VMEM copy)
        o_ref[0, 0] = r.astype(o_ref.dtype)
        o_ref[0, 1] = g.astype(o_ref.dtype)
        o_ref[0, 2] = b.astype(o_ref.dtype)

    return kernel


# ---------------------------------------------------------------------------
# Wrapper
# ---------------------------------------------------------------------------
def color_jitter_pallas(img, factors, apply_b, apply_c, apply_s, apply_h,
                        *, row_tile=512):
    """img: (N, 3, H, W) float in [0, 1]; factors: (4,) f32 jitter factors."""
    n, c, h, w = img.shape
    assert c == 3, "ColorJitter kernel expects RGB (C == 3) images"

    p = h * w
    p_pad = ((p + 127) // 128) * 128
    x = img.reshape(n, c, p)
    if p_pad != p:
        x = jnp.pad(x, ((0, 0), (0, 0), (0, p_pad - p)))
    rows = p_pad // 128
    x = x.reshape(n, c, rows, 128)          # lane-dense, full-sublane channel slabs

    tr = min(rows, row_tile)                # pixel-row tile: ~1.5*tr KiB per block
    grid = (n, pl.cdiv(rows, tr))

    factors = factors.astype(jnp.float32)
    if apply_c:
        # Contrast mean over the *post-brightness* image (tiny XLA pre-pass),
        # so every pixel tile of the kernel is fully independent.
        bf = factors[0] if apply_b else jnp.float32(1.0)
        xb = jnp.clip(img.astype(jnp.float32) * bf, 0.0, 1.0)
        gray = 0.2989 * xb[:, 0] + 0.587 * xb[:, 1] + 0.114 * xb[:, 2]
        means = jnp.mean(gray, axis=(1, 2))
    else:
        means = jnp.zeros((n,), jnp.float32)
    scal = jnp.concatenate([factors, means]).astype(jnp.float32)

    kernel = _make_kernel(apply_b, apply_c, apply_s, apply_h)

    out = pl.pallas_call(
        kernel,
        out_shape=jax.ShapeDtypeStruct((n, c, rows, 128), img.dtype),
        grid_spec=pltpu.PrefetchScalarGridSpec(
            num_scalar_prefetch=1,
            grid=grid,
            in_specs=[pl.BlockSpec((1, c, tr, 128),
                                   lambda i, t, scal: (i, 0, t, 0))],
            out_specs=pl.BlockSpec((1, c, tr, 128),
                                   lambda i, t, scal: (i, 0, t, 0)),
        ),
        compiler_params=pltpu.CompilerParams(
            dimension_semantics=("parallel", "parallel")),
    )(scal, x)

    out = out.reshape(n, c, p_pad)
    if p_pad != p:
        out = out[:, :, :p]
    return out.reshape(n, c, h, w)


def _draw_params(key, brightness, contrast, saturation, hue):
    """Torchvision-style random factors; identity factor when an amount is 0."""
    kb, kc, ks, kh = jax.random.split(key, 4)

    def factor(k, amt):
        if amt == 0:
            return jnp.float32(1.0)
        lo, hi = max(0.0, 1.0 - float(amt)), 1.0 + float(amt)
        return jax.random.uniform(k, (), jnp.float32, lo, hi)

    b = factor(kb, brightness)
    cc = factor(kc, contrast)
    s = factor(ks, saturation)
    if hue == 0:
        hh = jnp.float32(0.0)
    else:
        hh = jax.random.uniform(kh, (), jnp.float32, -float(hue), float(hue))
    return jnp.stack([b, cc, s, hh]).astype(jnp.float32)


def color_jitter(img, key, brightness=0, contrast=0, saturation=0, hue=0):
    """Full ColorJitter forward. Defaults (0,0,0,0) == identity (stub path)."""
    if brightness == 0 and contrast == 0 and saturation == 0 and hue == 0:
        # Matches the pytea stub / torchvision no-op exactly: no kernel launch.
        return img
    factors = _draw_params(key, brightness, contrast, saturation, hue)
    return color_jitter_pallas(img, factors,
                               brightness != 0, contrast != 0,
                               saturation != 0, hue != 0)


# ---------------------------------------------------------------------------
# Pure-JAX reference (literal torchvision formulas, 6-way select HSV->RGB).
# ---------------------------------------------------------------------------
def _ref_color_jitter(img, factors):
    bf, cf, sf, hf = factors[0], factors[1], factors[2], factors[3]
    x = img.astype(jnp.float32)
    x = jnp.clip(x * bf, 0.0, 1.0)

    def gray(t):
        return 0.2989 * t[:, 0:1] + 0.587 * t[:, 1:2] + 0.114 * t[:, 2:3]

    mean = jnp.mean(gray(x), axis=(1, 2, 3), keepdims=True)
    x = jnp.clip(cf * x + (1.0 - cf) * mean, 0.0, 1.0)
    x = jnp.clip(sf * x + (1.0 - sf) * gray(x), 0.0, 1.0)

    r, g, b = x[:, 0], x[:, 1], x[:, 2]
    maxc = jnp.maximum(jnp.maximum(r, g), b)
    minc = jnp.minimum(jnp.minimum(r, g), b)
    eqc = maxc == minc
    crm = maxc - minc
    ones = jnp.ones_like(maxc)
    sat = crm / jnp.where(eqc, ones, maxc)
    crd = jnp.where(eqc, ones, crm)
    rc = (maxc - r) / crd
    gc = (maxc - g) / crd
    bc = (maxc - b) / crd
    hr = jnp.where(maxc == r, bc - gc, 0.0)
    hg = jnp.where((maxc == g) & (maxc != r), 2.0 + rc - bc, 0.0)
    hb = jnp.where((maxc != g) & (maxc != r), 4.0 + gc - rc, 0.0)
    h = (hr + hg + hb) / 6.0 + 1.0
    h = h - jnp.floor(h)
    h = h + hf
    h = h - jnp.floor(h)

    i = jnp.floor(h * 6.0)
    f = h * 6.0 - i
    ii = i.astype(jnp.int32) % 6
    v = maxc
    pp = jnp.clip(v * (1.0 - sat), 0.0, 1.0)
    qq = jnp.clip(v * (1.0 - sat * f), 0.0, 1.0)
    tt = jnp.clip(v * (1.0 - sat * (1.0 - f)), 0.0, 1.0)

    def sel(vals):
        out = jnp.zeros_like(v)
        for k in range(6):
            out = jnp.where(ii == k, vals[k], out)
        return out

    ro = sel([v, qq, pp, pp, tt, v])
    go = sel([tt, v, v, qq, pp, pp])
    bo = sel([pp, pp, tt, v, v, qq])
    return jnp.stack([ro, go, bo], axis=1).astype(img.dtype)


if __name__ == "__main__":
    key = jax.random.PRNGKey(0)
    k_img, k_jit = jax.random.split(key)

    # Small NCHW float RGB batch in [0, 1]: (N, C, H, W) = (2, 3, 16, 16).
    img = jax.random.uniform(k_img, (2, 3, 16, 16), dtype=jnp.float32)

    # Non-trivial jitter so all four stages run in the kernel.
    factors = _draw_params(k_jit, brightness=0.4, contrast=0.4,
                           saturation=0.4, hue=0.1)

    out = color_jitter_pallas(img, factors, True, True, True, True)
    out = jax.block_until_ready(out)

    ref = _ref_color_jitter(img, factors)
    assert out.shape == img.shape and out.dtype == img.dtype
    err = float(jnp.max(jnp.abs(out.astype(jnp.float32) - ref.astype(jnp.float32))))
    assert err < 1e-4, f"mismatch vs reference: max abs err = {err}"

    # Default (all-zero) params: identity fast path, matches the stub exactly.
    ident = color_jitter(img, k_jit)
    assert ident is img

    print("KERNEL_OK")
</pallas_src>

<mosaic_0001>
module attributes {stable_mosaic.version = 11 : i64} {
  func.func @kernel(%arg0: i32, %arg1: i32, %arg2: memref<6xf32, #tpu.memory_space<smem>>, %arg3: memref<1x3x2x128xf32, #tpu.memory_space<vmem>>, %arg4: memref<1x3x2x128xf32, #tpu.memory_space<vmem>>) attributes {dimension_semantics = [#tpu.dimension_semantics<parallel>, #tpu.dimension_semantics<parallel>], iteration_bounds = array<i64: 2, 1>, scalar_prefetch = 1 : i64, scratch_operands = 0 : i64, tpu.core_type = #tpu.core_type<tc>, window_params = [{transform_indices = @transform_0, window_bounds = array<i64: 1, 3, 2, 128>}, {transform_indices = @transform_1, window_bounds = array<i64: 1, 3, 2, 128>}]} {
    %c0 = arith.constant 0 : index
    %c0_0 = arith.constant 0 : index
    %c0_1 = arith.constant 0 : index
    %c0_2 = arith.constant 0 : index
    %0 = vector.load %arg3[%c0, %c0_0, %c0_1, %c0_2] : memref<1x3x2x128xf32, #tpu.memory_space<vmem>>, vector<1x1x2x128xf32>
    %1 = vector.shape_cast %0 : vector<1x1x2x128xf32> to vector<2x128xf32>
    %c0_3 = arith.constant 0 : index
    %c1 = arith.constant 1 : index
    %c0_4 = arith.constant 0 : index
    %c0_5 = arith.constant 0 : index
    %2 = vector.load %arg3[%c0_3, %c1, %c0_4, %c0_5] : memref<1x3x2x128xf32, #tpu.memory_space<vmem>>, vector<1x1x2x128xf32>
    %3 = vector.shape_cast %2 : vector<1x1x2x128xf32> to vector<2x128xf32>
    %c0_6 = arith.constant 0 : index
    %c2 = arith.constant 2 : index
    %c0_7 = arith.constant 0 : index
    %c0_8 = arith.constant 0 : index
    %4 = vector.load %arg3[%c0_6, %c2, %c0_7, %c0_8] : memref<1x3x2x128xf32, #tpu.memory_space<vmem>>, vector<1x1x2x128xf32>
    %5 = vector.shape_cast %4 : vector<1x1x2x128xf32> to vector<2x128xf32>
    %c0_9 = arith.constant 0 : index
    %6 = memref.load %arg2[%c0_9] : memref<6xf32, #tpu.memory_space<smem>>
    %7 = vector.broadcast %6 : f32 to vector<2x128xf32>
    %8 = arith.mulf %1, %7 : vector<2x128xf32>
    %cst = arith.constant 0.000000e+00 : f32
    %cst_10 = arith.constant 1.000000e+00 : f32
    %9 = vector.broadcast %cst : f32 to vector<2x128xf32>
    %10 = arith.maximumf %9, %8 : vector<2x128xf32>
    %11 = vector.broadcast %cst_10 : f32 to vector<2x128xf32>
    %12 = arith.minimumf %11, %10 : vector<2x128xf32>
    %13 = vector.broadcast %6 : f32 to vector<2x128xf32>
    %14 = arith.mulf %3, %13 : vector<2x128xf32>
    %cst_11 = arith.constant 0.000000e+00 : f32
    %cst_12 = arith.constant 1.000000e+00 : f32
    %15 = vector.broadcast %cst_11 : f32 to vector<2x128xf32>
    %16 = arith.maximumf %15, %14 : vector<2x128xf32>
    %17 = vector.broadcast %cst_12 : f32 to vector<2x128xf32>
    %18 = arith.minimumf %17, %16 : vector<2x128xf32>
    %19 = vector.broadcast %6 : f32 to vector<2x128xf32>
    %20 = arith.mulf %5, %19 : vector<2x128xf32>
    %cst_13 = arith.constant 0.000000e+00 : f32
    %cst_14 = arith.constant 1.000000e+00 : f32
    %21 = vector.broadcast %cst_13 : f32 to vector<2x128xf32>
    %22 = arith.maximumf %21, %20 : vector<2x128xf32>
    %23 = vector.broadcast %cst_14 : f32 to vector<2x128xf32>
    %24 = arith.minimumf %23, %22 : vector<2x128xf32>
    %c1_15 = arith.constant 1 : index
    %25 = memref.load %arg2[%c1_15] : memref<6xf32, #tpu.memory_space<smem>>
    %c4_i32 = arith.constant 4 : i32
    %26 = arith.addi %c4_i32, %arg0 : i32
    %27 = arith.index_cast %26 : i32 to index
    %28 = memref.load %arg2[%27] : memref<6xf32, #tpu.memory_space<smem>>
    %cst_16 = arith.constant 1.000000e+00 : f32
    %29 = arith.subf %cst_16, %25 : f32
    %30 = arith.mulf %29, %28 : f32
    %31 = vector.broadcast %25 : f32 to vector<2x128xf32>
    %32 = arith.mulf %31, %12 : vector<2x128xf32>
    %33 = vector.broadcast %30 : f32 to vector<2x128xf32>
    %34 = arith.addf %32, %33 : vector<2x128xf32>
    %cst_17 = arith.constant 0.000000e+00 : f32
    %cst_18 = arith.constant 1.000000e+00 : f32
    %35 = vector.broadcast %cst_17 : f32 to vector<2x128xf32>
    %36 = arith.maximumf %35, %34 : vector<2x128xf32>
    %37 = vector.broadcast %cst_18 : f32 to vector<2x128xf32>
    %38 = arith.minimumf %37, %36 : vector<2x128xf32>
    %39 = vector.broadcast %25 : f32 to vector<2x128xf32>
    %40 = arith.mulf %39, %18 : vector<2x128xf32>
    %41 = vector.broadcast %30 : f32 to vector<2x128xf32>
    %42 = arith.addf %40, %41 : vector<2x128xf32>
    %cst_19 = arith.constant 0.000000e+00 : f32
    %cst_20 = arith.constant 1.000000e+00 : f32
    %43 = vector.broadcast %cst_19 : f32 to vector<2x128xf32>
    %44 = arith.maximumf %43, %42 : vector<2x128xf32>
    %45 = vector.broadcast %cst_20 : f32 to vector<2x128xf32>
    %46 = arith.minimumf %45, %44 : vector<2x128xf32>
    %47 = vector.broadcast %25 : f32 to vector<2x128xf32>
    %48 = arith.mulf %47, %24 : vector<2x128xf32>
    %49 = vector.broadcast %30 : f32 to vector<2x128xf32>
    %50 = arith.addf %48, %49 : vector<2x128xf32>
    %cst_21 = arith.constant 0.000000e+00 : f32
    %cst_22 = arith.constant 1.000000e+00 : f32
    %51 = vector.broadcast %cst_21 : f32 to vector<2x128xf32>
    %52 = arith.maximumf %51, %50 : vector<2x128xf32>
    %53 = vector.broadcast %cst_22 : f32 to vector<2x128xf32>
    %54 = arith.minimumf %53, %52 : vector<2x128xf32>
    %c2_23 = arith.constant 2 : index
    %55 = memref.load %arg2[%c2_23] : memref<6xf32, #tpu.memory_space<smem>>
    %cst_24 = arith.constant 1.000000e+00 : f32
    %56 = arith.subf %cst_24, %55 : f32
    %cst_25 = arith.constant 2.989000e-01 : f32
    %57 = vector.broadcast %cst_25 : f32 to vector<2x128xf32>
    %58 = arith.mulf %57, %38 : vector<2x128xf32>
    %cst_26 = arith.constant 5.870000e-01 : f32
    %59 = vector.broadcast %cst_26 : f32 to vector<2x128xf32>
    %60 = arith.mulf %59, %46 : vector<2x128xf32>
    %61 = arith.addf %58, %60 : vector<2x128xf32>
    %cst_27 = arith.constant 1.140000e-01 : f32
    %62 = vector.broadcast %cst_27 : f32 to vector<2x128xf32>
    %63 = arith.mulf %62, %54 : vector<2x128xf32>
    %64 = arith.addf %61, %63 : vector<2x128xf32>
    %65 = vector.broadcast %56 : f32 to vector<2x128xf32>
    %66 = arith.mulf %65, %64 : vector<2x128xf32>
    %67 = vector.broadcast %55 : f32 to vector<2x128xf32>
    %68 = arith.mulf %67, %38 : vector<2x128xf32>
    %69 = arith.addf %68, %66 : vector<2x128xf32>
    %cst_28 = arith.constant 0.000000e+00 : f32
    %cst_29 = arith.constant 1.000000e+00 : f32
    %70 = vector.broadcast %cst_28 : f32 to vector<2x128xf32>
    %71 = arith.maximumf %70, %69 : vector<2x128xf32>
    %72 = vector.broadcast %cst_29 : f32 to vector<2x128xf32>
    %73 = arith.minimumf %72, %71 : vector<2x128xf32>
    %74 = vector.broadcast %55 : f32 to vector<2x128xf32>
    %75 = arith.mulf %74, %46 : vector<2x128xf32>
    %76 = arith.addf %75, %66 : vector<2x128xf32>
    %cst_30 = arith.constant 0.000000e+00 : f32
    %cst_31 = arith.constant 1.000000e+00 : f32
    %77 = vector.broadcast %cst_30 : f32 to vector<2x128xf32>
    %78 = arith.maximumf %77, %76 : vector<2x128xf32>
    %79 = vector.broadcast %cst_31 : f32 to vector<2x128xf32>
    %80 = arith.minimumf %79, %78 : vector<2x128xf32>
    %81 = vector.broadcast %55 : f32 to vector<2x128xf32>
    %82 = arith.mulf %81, %54 : vector<2x128xf32>
    %83 = arith.addf %82, %66 : vector<2x128xf32>
    %cst_32 = arith.constant 0.000000e+00 : f32
    %cst_33 = arith.constant 1.000000e+00 : f32
    %84 = vector.broadcast %cst_32 : f32 to vector<2x128xf32>
    %85 = arith.maximumf %84, %83 : vector<2x128xf32>
    %86 = vector.broadcast %cst_33 : f32 to vector<2x128xf32>
    %87 = arith.minimumf %86, %85 : vector<2x128xf32>
    %c3 = arith.constant 3 : index
    %88 = memref.load %arg2[%c3] : memref<6xf32, #tpu.memory_space<smem>>
    %89 = arith.maximumf %73, %80 : vector<2x128xf32>
    %90 = arith.maximumf %89, %87 : vector<2x128xf32>
    %91 = arith.minimumf %73, %80 : vector<2x128xf32>
    %92 = arith.minimumf %91, %87 : vector<2x128xf32>
    %93 = arith.cmpf oeq, %90, %92 : vector<2x128xf32>
    %94 = arith.subf %90, %92 : vector<2x128xf32>
    %cst_34 = arith.constant 1.000000e+00 : f32
    %95 = vector.broadcast %cst_34 : f32 to vector<2x128xf32>
    %96 = arith.select %93, %95, %90 : vector<2x128xi1>, vector<2x128xf32>
    %cst_35 = arith.constant 1.000000e+00 : f32
    %97 = vector.broadcast %cst_35 : f32 to vector<2x128xf32>
    %98 = arith.divf %97, %96 : vector<2x128xf32>
    %99 = arith.select %93, %95, %94 : vector<2x128xi1>, vector<2x128xf32>
    %cst_36 = arith.constant 1.000000e+00 : f32
    %100 = vector.broadcast %cst_36 : f32 to vector<2x128xf32>
    %101 = arith.divf %100, %99 : vector<2x128xf32>
    %102 = arith.mulf %94, %98 : vector<2x128xf32>
    %103 = arith.cmpf oeq, %90, %73 : vector<2x128xf32>
    %104 = arith.cmpf oeq, %90, %80 : vector<2x128xf32>
    %cst_37 = arith.constant dense<true> : vector<2x128xi1>
    %105 = arith.xori %103, %cst_37 : vector<2x128xi1>
    %106 = arith.andi %104, %105 : vector<2x128xi1>
    %107 = arith.subf %80, %87 : vector<2x128xf32>
    %108 = arith.subf %87, %73 : vector<2x128xf32>
    %109 = arith.subf %73, %80 : vector<2x128xf32>
    %110 = arith.select %106, %108, %109 : vector<2x128xi1>, vector<2x128xf32>
    %111 = arith.select %103, %107, %110 : vector<2x128xi1>, vector<2x128xf32>
    %cst_38 = arith.constant 2.000000e+00 : f32
    %cst_39 = arith.constant 4.000000e+00 : f32
    %112 = vector.broadcast %cst_38 : f32 to vector<2x128xf32>
    %113 = vector.broadcast %cst_39 : f32 to vector<2x128xf32>
    %114 = arith.select %106, %112, %113 : vector<2x128xi1>, vector<2x128xf32>
    %cst_40 = arith.constant 0.000000e+00 : f32
    %115 = vector.broadcast %cst_40 : f32 to vector<2x128xf32>
    %116 = arith.select %103, %115, %114 : vector<2x128xi1>, vector<2x128xf32>
    %117 = arith.mulf %111, %101 : vector<2x128xf32>
    %118 = arith.addf %117, %116 : vector<2x128xf32>
    %cst_41 = arith.constant 0.166666672 : f32
    %119 = vector.broadcast %cst_41 : f32 to vector<2x128xf32>
    %120 = arith.mulf %118, %119 : vector<2x128xf32>
    %cst_42 = arith.constant 1.000000e+00 : f32
    %121 = vector.broadcast %cst_42 : f32 to vector<2x128xf32>
    %122 = arith.addf %120, %121 : vector<2x128xf32>
    %123 = math.floor %122 : vector<2x128xf32>
    %124 = arith.subf %122, %123 : vector<2x128xf32>
    %125 = vector.broadcast %88 : f32 to vector<2x128xf32>
    %126 = arith.addf %124, %125 : vector<2x128xf32>
    %127 = math.floor %126 : vector<2x128xf32>
    %128 = arith.subf %126, %127 : vector<2x128xf32>
    %cst_43 = arith.constant 6.000000e+00 : f32
    %129 = vector.broadcast %cst_43 : f32 to vector<2x128xf32>
    %130 = arith.mulf %128, %129 : vector<2x128xf32>
    %131 = arith.mulf %90, %102 : vector<2x128xf32>
    %cst_44 = arith.constant 5.000000e+00 : f32
    %132 = vector.broadcast %cst_44 : f32 to vector<2x128xf32>
    %133 = arith.addf %132, %130 : vector<2x128xf32>
    %cst_45 = arith.constant 6.000000e+00 : f32
    %134 = vector.broadcast %cst_45 : f32 to vector<2x128xf32>
    %135 = arith.cmpf oge, %133, %134 : vector<2x128xf32>
    %cst_46 = arith.constant 6.000000e+00 : f32
    %136 = vector.broadcast %cst_46 : f32 to vector<2x128xf32>
    %137 = arith.subf %133, %136 : vector<2x128xf32>
    %138 = arith.select %135, %137, %133 : vector<2x128xi1>, vector<2x128xf32>
    %cst_47 = arith.constant 4.000000e+00 : f32
    %139 = vector.broadcast %cst_47 : f32 to vector<2x128xf32>
    %140 = arith.subf %139, %138 : vector<2x128xf32>
    %141 = arith.minimumf %138, %140 : vector<2x128xf32>
    %cst_48 = arith.constant 0.000000e+00 : f32
    %cst_49 = arith.constant 1.000000e+00 : f32
    %142 = vector.broadcast %cst_48 : f32 to vector<2x128xf32>
    %143 = arith.maximumf %142, %141 : vector<2x128xf32>
    %144 = vector.broadcast %cst_49 : f32 to vector<2x128xf32>
    %145 = arith.minimumf %144, %143 : vector<2x128xf32>
    %146 = arith.mulf %131, %145 : vector<2x128xf32>
    %147 = arith.subf %90, %146 : vector<2x128xf32>
    %cst_50 = arith.constant 3.000000e+00 : f32
    %148 = vector.broadcast %cst_50 : f32 to vector<2x128xf32>
    %149 = arith.addf %148, %130 : vector<2x128xf32>
    %cst_51 = arith.constant 6.000000e+00 : f32
    %150 = vector.broadcast %cst_51 : f32 to vector<2x128xf32>
    %151 = arith.cmpf oge, %149, %150 : vector<2x128xf32>
    %cst_52 = arith.constant 6.000000e+00 : f32
    %152 = vector.broadcast %cst_52 : f32 to vector<2x128xf32>
    %153 = arith.subf %149, %152 : vector<2x128xf32>
    %154 = arith.select %151, %153, %149 : vector<2x128xi1>, vector<2x128xf32>
    %cst_53 = arith.constant 4.000000e+00 : f32
    %155 = vector.broadcast %cst_53 : f32 to vector<2x128xf32>
    %156 = arith.subf %155, %154 : vector<2x128xf32>
    %157 = arith.minimumf %154, %156 : vector<2x128xf32>
    %cst_54 = arith.constant 0.000000e+00 : f32
    %cst_55 = arith.constant 1.000000e+00 : f32
    %158 = vector.broadcast %cst_54 : f32 to vector<2x128xf32>
    %159 = arith.maximumf %158, %157 : vector<2x128xf32>
    %160 = vector.broadcast %cst_55 : f32 to vector<2x128xf32>
    %161 = arith.minimumf %160, %159 : vector<2x128xf32>
    %162 = arith.mulf %131, %161 : vector<2x128xf32>
    %163 = arith.subf %90, %162 : vector<2x128xf32>
    %cst_56 = arith.constant 1.000000e+00 : f32
    %164 = vector.broadcast %cst_56 : f32 to vector<2x128xf32>
    %165 = arith.addf %164, %130 : vector<2x128xf32>
    %cst_57 = arith.constant 6.000000e+00 : f32
    %166 = vector.broadcast %cst_57 : f32 to vector<2x128xf32>
    %167 = arith.cmpf oge, %165, %166 : vector<2x128xf32>
    %cst_58 = arith.constant 6.000000e+00 : f32
    %168 = vector.broadcast %cst_58 : f32 to vector<2x128xf32>
    %169 = arith.subf %165, %168 : vector<2x128xf32>
    %170 = arith.select %167, %169, %165 : vector<2x128xi1>, vector<2x128xf32>
    %cst_59 = arith.constant 4.000000e+00 : f32
    %171 = vector.broadcast %cst_59 : f32 to vector<2x128xf32>
    %172 = arith.subf %171, %170 : vector<2x128xf32>
    %173 = arith.minimumf %170, %172 : vector<2x128xf32>
    %cst_60 = arith.constant 0.000000e+00 : f32
    %cst_61 = arith.constant 1.000000e+00 : f32
    %174 = vector.broadcast %cst_60 : f32 to vector<2x128xf32>
    %175 = arith.maximumf %174, %173 : vector<2x128xf32>
    %176 = vector.broadcast %cst_61 : f32 to vector<2x128xf32>
    %177 = arith.minimumf %176, %175 : vector<2x128xf32>
    %178 = arith.mulf %131, %177 : vector<2x128xf32>
    %179 = arith.subf %90, %178 : vector<2x128xf32>
    %c0_62 = arith.constant 0 : index
    %c0_63 = arith.constant 0 : index
    %c0_64 = arith.constant 0 : index
    %c0_65 = arith.constant 0 : index
    %180 = vector.load %arg4[%c0_62, %c0_63, %c0_64, %c0_65] : memref<1x3x2x128xf32, #tpu.memory_space<vmem>>, vector<1x1x2x128xf32>
    %181 = vector.shape_cast %180 : vector<1x1x2x128xf32> to vector<2x128xf32>
    %182 = vector.shape_cast %147 : vector<2x128xf32> to vector<1x1x2x128xf32>
    tpu.vector_store %arg4[%c0_62, %c0_63, %c0_64, %c0_65], %182 {strides = array<i32>} : memref<1x3x2x128xf32, #tpu.memory_space<vmem>>, vector<1x1x2x128xf32>,
    %c0_66 = arith.constant 0 : index
    %c1_67 = arith.constant 1 : index
    %c0_68 = arith.constant 0 : index
    %c0_69 = arith.constant 0 : index
    %183 = vector.load %arg4[%c0_66, %c1_67, %c0_68, %c0_69] : memref<1x3x2x128xf32, #tpu.memory_space<vmem>>, vector<1x1x2x128xf32>
    %184 = vector.shape_cast %183 : vector<1x1x2x128xf32> to vector<2x128xf32>
    %185 = vector.shape_cast %163 : vector<2x128xf32> to vector<1x1x2x128xf32>
    tpu.vector_store %arg4[%c0_66, %c1_67, %c0_68, %c0_69], %185 {strides = array<i32>} : memref<1x3x2x128xf32, #tpu.memory_space<vmem>>, vector<1x1x2x128xf32>,
    %c0_70 = arith.constant 0 : index
    %c2_71 = arith.constant 2 : index
    %c0_72 = arith.constant 0 : index
    %c0_73 = arith.constant 0 : index
    %186 = vector.load %arg4[%c0_70, %c2_71, %c0_72, %c0_73] : memref<1x3x2x128xf32, #tpu.memory_space<vmem>>, vector<1x1x2x128xf32>
    %187 = vector.shape_cast %186 : vector<1x1x2x128xf32> to vector<2x128xf32>
    %188 = vector.shape_cast %179 : vector<2x128xf32> to vector<1x1x2x128xf32>
    tpu.vector_store %arg4[%c0_70, %c2_71, %c0_72, %c0_73], %188 {strides = array<i32>} : memref<1x3x2x128xf32, #tpu.memory_space<vmem>>, vector<1x1x2x128xf32>,
    return
  }
  func.func @transform_0(%arg0: i32, %arg1: i32, %arg2: memref<6xf32, #tpu.memory_space<smem>>) -> (i32, i32, i32, i32) {
    %c0_i32 = arith.constant 0 : i32
    %c0_i32_0 = arith.constant 0 : i32
    %c0_i32_1 = arith.constant 0 : i32
    return %arg0, %c0_i32, %arg1, %c0_i32_0 : i32, i32, i32, i32
  }
  func.func @transform_1(%arg0: i32, %arg1: i32, %arg2: memref<6xf32, #tpu.memory_space<smem>>) -> (i32, i32, i32, i32) {
    %c0_i32 = arith.constant 0 : i32
    %c0_i32_0 = arith.constant 0 : i32
    %c0_i32_1 = arith.constant 0 : i32
    return %arg0, %c0_i32, %arg1, %c0_i32_0 : i32, i32, i32, i32
  }
}

</mosaic_0001>

<bundles_post_ra>
// kernel: tpu_custom_call.1
= control target key start
LH: loop header
LB: loop body
LE: loop exit
PB: predicated region body
PF: predicated region fallthrough
CT: control target
= control target key end

     0   :  { %s644_s12 = smov [#allocation3]   ;;  %s815_s0 = inlined_call_operand.hbm [shape: f32[6], index: 0, kind: input, shape index: {}]   ;;  %s816_s1 = inlined_call_operand.hbm [shape: f32[2,3,2,128], index: 1, kind: input, shape index: {}]   ;;  %s817_s2 = inlined_call_operand.hbm [shape: f32[2,3,2,128], index: 2, kind: output, shape index: {}]  }
   0x1   :  { %s8_s11 = sshll.u32 %s815_s0, 4  ;;  %s9_s11 = int_to_ptr.hbm [resolvable:$true] %s8_s11 }
   0x2   :  { %11 = dma.hbm_to_smem %s9_s11, 16, %s644_s12, [#allocation2] }
   0x3   :  { %610 = dma.done.wait [#allocation2], 16 }
   0x4   :  { %611 = vsyncadd [#allocation2], 4294967280 }
   0x5   :  { %14 = sfence }
   0x6   :  { %15 = vsyncpa [#allocation5], 0 }
   0x7   :  { %17 = vsyncpa [#allocation5 + $0x1], 0 }
   0x8   :  { %18 = vsyncpa [#allocation6], 0 }
   0x9   :  { %20 = vsyncpa [#allocation6 + $0x1], 0  ;;  %s669_s13 = smov 0   ;;  %s671_s14 = smov 0  }
   0xa   :  { %s673_s15 = smov 0   ;;  %s675_s16 = smov 0  }
   0xb   :  { %s677_s17 = smov 0   ;;  %s679_s0 = smov 0  }
   0xc LB: > { %s420_s18 = sadd.s32 4294967295, %s642_s0   ;;  %s421_s19 = sadd.s32 4294967294, %s642_s0   ;;  %s642_s0 = sphi %s679_s0, %s26_s0   ;;  %s638_s17 = sphi %s677_s17, %s826_s17   ;;  %s634_s16 = sphi %s675_s16, %s825_s16   ;;  %s630_s15 = sphi %s673_s15, %s824_s15   ;;  %s626_s14 = sphi %s671_s14, %s823_s14   ;;  %s622_s13 = sphi %s669_s13, %s822_s13  }
   0xd   : > { %s38_s20 = sadd.s32 1, %s638_s17  ;;  %s47_s21 = sadd.s32 1, %s630_s15 }
   0xe   : > { %p40_p0 = scmp.ge.s32.totalorder %s38_s20, 2  ;;  %p54_p1 = scmp.ne.s32.totalorder %s630_s15, %s626_s14 }
   0xf   : > { %p55_p2 = scmp.eq.s32.totalorder %s642_s0, 0  ;;  %p60_p3 = scmp.ne.s32.totalorder %s626_s14, %s622_s13 }
  0x10   : > { %s828_s20 = smov (%p40_p0, %s38_s20), 0  ;;  %p61_p5 = scmp.eq.s32.totalorder %s420_s18, 0 }
  0x11   : > { %p710_p4 = por %p55_p2, %p54_p1  ;;  %s42_s23 = ssub.s32 %s638_s17, %s828_s20 }
  0x12   : > { %p86_p6 = scmp.eq.s32.totalorder %s420_s18, 1  ;;  %p45_p7 = scmp.eq.s32.totalorder %s42_s23, 0 }
  0x13   : > { %p716_p8 = por %p61_p5, %p60_p3  ;;  %p92_p10 = scmp.eq.s32.totalorder %s421_s19, 1 }
  0x14   : > { %p720_p9 = por %p86_p6, %p54_p1  ;;  %p423_p12 = scmp.ge.s32.totalorder %s642_s0, 2 }
  0x15   : > { %s725_s26 = scalar_select %p45_p7, %s630_s15, %s47_s21  }
  0x16   : > { %p727_p11 = por %p92_p10, %p60_p3  ;;  %p455_p13 = scmp.lt.s32.totalorder %s642_s0, 2 }
  0x17   : > { %s112_s28 = sand.u32 1, %s630_s15   ;;  %s440_s30 = smul.u32 6, %s638_s17 }
  0x18   : > { %s439_s29 = smul.u32 6, %s112_s28  ;;  %p448_p0 = pnand %p455_p13, %p710_p4 }
  0x19   : > { %s122_s5 = scalar_lea.hbm %s816_s1, %s440_s30  ;;  %p425_p1 = scmp.ge.s32.totalorder %s642_s0, 1 }
  0x1a   : > { %s116_s6 = scalar_lea.vmem [#allocation4], %s439_s29  ;;  %s123_s8 = sshll.u32 %s122_s5, 4  ;;  %s124_s8 = int_to_ptr.hbm [resolvable:$true] %s123_s8 }
  0x1b   : > { %s125_s7 = sshll.u32 %s116_s6, 4  ;;  %s113_s9 = scalar_lea.sflag [#allocation5], %s112_s28  ;;  %s126_s7 = int_to_ptr.vmem [resolvable:$true] %s125_s7 }
  0x1c   : > { %s645_s10 = smov 32   ;;  %s646_s11 = smov 2  }
  0x1d   : > { %450 = dma.hbm_to_vmem [thread:$0]  (!%p448_p0), %s124_s8, 96, %s126_s7, %s113_s9, %s645_s10, %s645_s10, %s646_s11  }
  0x1e   : > { %p133_p2 = scmp.lt.s32.totalorder %s642_s0, 3 }
  0x20   : > { %p134_p3 = pnand %p425_p1, %p133_p2 }
  0x21   : > { %s743_s12 = sand.u32 (!%p134_p3), 1, %s626_s14  }
  0x22   : > { %137 = sbr.rel (%p134_p3) target bundleno = 142 (0x8e), region = 24  ;;  %s140_s19 = scalar_lea.sflag (!%p134_p3), [#allocation5], %s743_s12 }
  0x23   : > { %s441_s18 = smul.u32 (!%p134_p3), 6, %s743_s12 }
  0x25   : > { %s143_s21 = scalar_lea.vmem (!%p134_p3), [#allocation4], %s441_s18 }
  0x27   : > { %613 = dma.done.wait (%p716_p8), %s140_s19, 96  }
  0x28   : > { %615 = vsyncadd (%p716_p8), %s140_s19, 4294967200  ;;  %s180_s22 = sadd.s32 4, %s634_s16  ;;  %s168_s23 = sld [smem:[#allocation3]]  ;;  %v163_v0 = vld [vmem:[%s143_s21] sm:$0x3]  ;;  %vm647_vm3 = vmmov 1  }
  0x29   : > { %s428_s28 = sld [smem:[#allocation3 + $0x1]]  ;;  %v426_v1 = vld [vmem:[%s143_s21 + $0x2] sm:$0x3]  ;;  %v427_v3 = vld [vmem:[%s143_s21 + $0x4] sm:$0x3]  ;;  %s442_s6 = smul.u32 6, %s634_s16 }
  0x2a   : > { %s181_s29 = sld [smem:[#allocation3 + %s180_s22]]  ;;  %s162_s10 = scalar_lea.vmem [#allocation7], %s441_s18 }
  0x2b   : > { %s429_s24 = sld [smem:[#allocation3 + $0x2]]  ;;  %s331_s9 = scalar_lea.hbm %s817_s2, %s442_s6 }
  0x2c   : > { %s430_s5 = sld [smem:[#allocation3 + $0x3]]  ;;  %s332_s11 = sshll.u32 %s162_s10, 4  ;;  %s333_s11 = int_to_ptr.vmem [resolvable:$true] %s332_s11 }
  0x2d   : > { %s334_s16 = sshll.u32 %s331_s9, 4  ;;  %s319_s19 = scalar_lea.sflag [#allocation6], %s743_s12  ;;  %s335_s16 = int_to_ptr.hbm [resolvable:$true] %s334_s16 }
  0x2e   : > { %v169_v2 = vstv %s168_s23  ;;  %s572_s18 = sshra.s32 %s335_s16, 4  ;;  %s573_s18 = int_to_ptr.hbm [resolvable:$true] %s572_s18 }
  0x2f   : > { %v170_v4 = vmul.f32 %v169_v2, %v163_v0  ;;  %v173_v5 = vmul.f32 %v426_v1, %v169_v2  ;;  %v176_v6 = vmul.f32 %v427_v3, %v169_v2  ;;  %s182_s30 = ssub.f32 1.0, %s428_s28  ;;  %v184_v10 = vstv %s428_s28  ;;  %s574_s21 = scalar_lea.hbm %s573_s18, 6 }
  0x30   : > { %v648_v2 = vmov 4.0   ;;  %p575_p4 = scmp.ne.s32.totalorder %s573_s18, %s574_s21  ;;  %s578_s28 = scalar_lea.hbm %s817_s2, 12 }
  0x31   : > { %v171_v7 = vmax.f32 %v170_v4, 0.0  ;;  %v174_v8 = vmax.f32 %v173_v5, 0.0  ;;  %v177_v9 = vmax.f32 %v176_v6, 0.0  ;;  %s183_s3 = smul.f32 %s182_s30, %s181_s29  ;;  %s199_s4 = ssub.f32 1.0, %s429_s24  ;;  %v207_v30 = vstv %s429_s24 }
  0x32   : > { %p576_p5 = pnand %p575_p4, %p720_p9  ;;  %p579_p7 = scmp.lt.s32.totalorder %s573_s18, %s817_s2 }
  0x33   : > { %v172_v11 = vmin.f32 %v171_v7, 1.0  ;;  %v175_v12 = vmin.f32 %v174_v8, 1.0  ;;  %v178_v13 = vmin.f32 %v177_v9, 1.0  ;;  %v186_v14 = vstv %s183_s3  ;;  %p580_p8 = scmp.lt.s32.totalorder %s578_s28, %s574_s21 }
  0x34   : > { %v205_v32 = vstv %s199_s4  ;;  %p577_p6 = pneg %p576_p5 }
  0x35   : > { %v185_v15 = vmul.f32 %v184_v10, %v172_v11  ;;  %v190_v16 = vmul.f32 %v184_v10, %v175_v12  ;;  %v194_v17 = vmul.f32 %v184_v10, %v178_v13  ;;  %p581_p10 = por %p580_p8, %p579_p7 }
  0x37   : > { %v187_v18 = vadd.f32 %v186_v14, %v185_v15  ;;  %v191_v19 = vadd.f32 %v190_v16, %v186_v14  ;;  %v195_v20 = vadd.f32 %v194_v17, %v186_v14  ;;  %v277_v16 = vstv %s430_s5  ;;  %p582_p13 = pnand %p581_p10, %p577_p6 }
  0x39   : > { %v188_v21 = vmax.f32 %v187_v18, 0.0  ;;  %v192_v22 = vmax.f32 %v191_v19, 0.0  ;;  %v196_v23 = vmax.f32 %v195_v20, 0.0 }
  0x3b   : > { %v189_v24 = vmin.f32 %v188_v21, 1.0  ;;  %v193_v25 = vmin.f32 %v192_v22, 1.0  ;;  %v197_v26 = vmin.f32 %v196_v23, 1.0 }
  0x3d   : > { %v200_v27 = vmul.f32 0.2989, %v189_v24  ;;  %v201_v28 = vmul.f32 0.587, %v193_v25  ;;  %v203_v29 = vmul.f32 0.114, %v197_v26  ;;  %v208_v34 = vmul.f32 %v207_v30, %v189_v24 }
  0x3e   : > { %v212_v35 = vmul.f32 %v207_v30, %v193_v25  ;;  %v216_v36 = vmul.f32 %v207_v30, %v197_v26 }
  0x3f   : > { %v202_v31 = vadd.f32 %v201_v28, %v200_v27 }
  0x41   : > { %v204_v33 = vadd.f32 %v203_v29, %v202_v31 }
  0x43   : > { %v206_v37 = vmul.f32 %v205_v32, %v204_v33 }
  0x45   : > { %v209_v38 = vadd.f32 %v208_v34, %v206_v37  ;;  %v213_v39 = vadd.f32 %v212_v35, %v206_v37  ;;  %v217_v40 = vadd.f32 %v216_v36, %v206_v37 }
  0x47   : > { %v210_v41 = vmax.f32 %v209_v38, 0.0  ;;  %v214_v42 = vmax.f32 %v213_v39, 0.0  ;;  %v218_v43 = vmax.f32 %v217_v40, 0.0 }
  0x49   : > { %v211_v44 = vmin.f32 %v210_v41, 1.0  ;;  %v215_v45 = vmin.f32 %v214_v42, 1.0  ;;  %v219_v46 = vmin.f32 %v218_v43, 1.0 }
  0x4b   : > { %v221_v47 = vmax.f32 %v211_v44, %v215_v45  ;;  %v223_v48 = vmin.f32 %v211_v44, %v215_v45  ;;  %v265_v56 = vsub.f32 %v219_v46, %v211_v44  ;;  %v266_v57 = vsub.f32 %v211_v44, %v215_v45 }
  0x4c   : > { %v264_v61 = vsub.f32 %v215_v45, %v219_v46 }
  0x4d   : > { %v754_v49 = vmax.f32 %v221_v47, %v219_v46  ;;  %v224_v50 = vmin.f32 %v223_v48, %v219_v46 }
  0x4f   : > { %vm225_vm0 = vcmp.eq.f32.partialorder %v754_v49, %v224_v50  ;;  %v758_v51 = vsub.f32 %v754_v49, %v224_v50  ;;  %vm260_vm1 = vcmp.eq.f32.partialorder %v754_v49, %v211_v44  ;;  %vm261_vm2 = vcmp.eq.f32.partialorder %v754_v49, %v215_v45 }
  0x50   : > { %vm262_vm4 = vmxor %vm260_vm1, %vm647_vm3  ;;  %v227_v54 = vsel %vm225_vm0, 1.0, %v754_v49 }
  0x51   : > { %v243_v52 = vsel %vm225_vm0, 1.0, %v758_v51  ;;  %vm263_vm5 = vmand %vm261_vm2, %vm262_vm4  ;;  %vm233_vm10 = vweird.f32 %v227_v54  ;;  %v239_v20 = vand.u32 2147483648, %v227_v54  ;;  %v237_v22 = vand.u32 2147483647, %v227_v54 }
  0x52   : > { %512 = vrcp.f32 %v243_v52  ;;  %v255_v58 = vand.u32 2147483648, %v243_v52  ;;  %vm249_vm6 = vweird.f32 %v243_v52  ;;  %v253_v60 = vand.u32 2147483647, %v243_v52 }
  0x53   : > { %514 = vrcp.f32 %v227_v54  ;;  %v267_v63 = vsel %vm263_vm5, %v265_v56, %v266_v57  ;;  %v269_v3 = vsel %vm263_vm5, 2.0, %v648_v2  ;;  %v240_v25 = vor.u32 1.1754944e-38, %v239_v20 }
  0x54   : > { %v256_v0 = vor.u32 1.1754944e-38, %v255_v58  ;;  %vm254_vm9 = vcmp.eq.f32.partialorder %v253_v60, 8.507059e+37  ;;  %v268_v4 = vsel %vm260_vm1, %v264_v61, %v267_v63  ;;  %v270_v8 = vsel %vm260_vm1, 0.0, %v269_v3 }
  0x55   : > { %vm238_vm13 = vcmp.eq.f32.partialorder %v237_v22, 8.507059e+37 }
  0x58   : > { %v513_v53 = vpop.eup %512 }
  0x59   : > { %v245_v55 = vmul.f32 %v513_v53, %v243_v52  ;;  %vm250_vm7 = vweird.f32 %v513_v53  ;;  %v515_v6 = vpop.eup %514 }
  0x5a   : > { %vm251_vm8 = vmor %vm249_vm6, %vm250_vm7  ;;  %v229_v10 = vmul.f32 %v515_v6, %v227_v54  ;;  %vm234_vm11 = vweird.f32 %v515_v6 }
  0x5b   : > { %v246_v59 = vsub.f32 1.0, %v245_v55  ;;  %vm235_vm12 = vmor %vm233_vm10, %vm234_vm11 }
  0x5c   : > { %v230_v13 = vsub.f32 1.0, %v229_v10 }
  0x5d   : > { %v247_v62 = vmul.f32 %v513_v53, %v246_v59 }
  0x5e   : > { %v231_v17 = vmul.f32 %v515_v6, %v230_v13 }
  0x5f   : > { %v248_v1 = vadd.f32 %v513_v53, %v247_v62 }
  0x60   : > { %v232_v21 = vadd.f32 %v515_v6, %v231_v17 }
  0x61   : > { %v252_v5 = vsel %vm251_vm8, %v513_v53, %v248_v1 }
  0x62   : > { %v257_v7 = vsel %vm254_vm9, %v256_v0, %v252_v5  ;;  %v236_v26 = vsel %vm235_vm12, %v515_v6, %v232_v21 }
  0x63   : > { %v271_v9 = vmul.f32 %v268_v4, %v257_v7  ;;  %v241_v31 = vsel %vm238_vm13, %v240_v25, %v236_v26 }
  0x64   : > { %v259_v37 = vmul.f32 %v241_v31, %v758_v51 }
  0x65   : > { %v272_v11 = vadd.f32 %v271_v9, %v270_v8 }
  0x66   : > { %v282_v45 = vmul.f32 %v259_v37, %v754_v49 }
  0x67   : > { %v273_v12 = vmul.f32 0.16666667, %v272_v11 }
  0x69   : > { %v274_v14 = vadd.f32 1.0, %v273_v12 }
  0x6b   : > { %v275_v15 = vfloor.f32 %v274_v14 }
  0x6d   : > { %v276_v18 = vsub.f32 %v274_v14, %v275_v15 }
  0x6f   : > { %v278_v19 = vadd.f32 %v277_v16, %v276_v18 }
  0x71   : > { %v279_v23 = vfloor.f32 %v278_v19 }
  0x73   : > { %v280_v24 = vsub.f32 %v278_v19, %v279_v23 }
  0x75   : > { %v281_v27 = vmul.f32 6.0, %v280_v24 }
  0x77   : > { %v283_v28 = vadd.f32 5.0, %v281_v27  ;;  %v293_v29 = vadd.f32 3.0, %v281_v27  ;;  %v303_v30 = vadd.f32 1.0, %v281_v27 }
  0x79   : > { %vm284_vm14 = vcmp.ge.f32.partialorder %v283_v28, 6.0  ;;  %v431_v32 = vadd.f32 -6.0, %v283_v28  ;;  %vm294_vm15 = vcmp.ge.f32.partialorder %v293_v29, 6.0  ;;  %v432_v33 = vadd.f32 -6.0, %v293_v29 }
  0x7a   : > { %vm304_vm0 = vcmp.ge.f32.partialorder %v303_v30, 6.0  ;;  %v433_v34 = vadd.f32 -6.0, %v303_v30 }
  0x7b   : > { %v286_v35 = vsel %vm284_vm14, %v431_v32, %v283_v28  ;;  %v296_v36 = vsel %vm294_vm15, %v432_v33, %v293_v29 }
  0x7c   : > { %v287_v38 = vsub.f32 4.0, %v286_v35  ;;  %v297_v39 = vsub.f32 4.0, %v296_v36  ;;  %v306_v40 = vsel %vm304_vm0, %v433_v34, %v303_v30 }
  0x7d   : > { %v307_v41 = vsub.f32 4.0, %v306_v40 }
  0x7e   : > { %v288_v42 = vmin.f32 %v286_v35, %v287_v38  ;;  %v298_v43 = vmin.f32 %v296_v36, %v297_v39 }
  0x7f   : > { %v308_v44 = vmin.f32 %v306_v40, %v307_v41 }
  0x80   : > { %v289_v46 = vmax.f32 %v288_v42, 0.0  ;;  %v299_v47 = vmax.f32 %v298_v43, 0.0 }
  0x81   : > { %v309_v48 = vmax.f32 %v308_v44, 0.0 }
  0x82   : > { %v290_v50 = vmin.f32 %v289_v46, 1.0  ;;  %v300_v52 = vmin.f32 %v299_v47, 1.0 }
  0x83   : > { %v310_v51 = vmin.f32 %v309_v48, 1.0 }
  0x84   : > { %v291_v53 = vmul.f32 %v290_v50, %v282_v45  ;;  %v301_v54 = vmul.f32 %v300_v52, %v282_v45 }
  0x85   : > { %v311_v55 = vmul.f32 %v310_v51, %v282_v45 }
  0x86   : > { %v292_v56 = vsub.f32 %v754_v49, %v291_v53  ;;  %v302_v57 = vsub.f32 %v754_v49, %v301_v54 }
  0x87   : > { %v312_v58 = vsub.f32 %v754_v49, %v311_v55 }
  0x88   : > { %313 = vst [vmem:[%s162_s10] sm:$0x3] %v292_v56 }
  0x89   : > { %434 = vst [vmem:[%s162_s10 + $0x2] sm:$0x3] %v302_v57 }
  0x8a   : > { %435 = vst [vmem:[%s162_s10 + $0x4] sm:$0x3] %v312_v58 }
  0x8b   : > { %585 = shalt.err (!%p582_p13)
}
  0x8c   : > { %s649_s12 = smov 32   ;;  %s650_s3 = smov 2  }
  0x8d   : > { %445 = dma.vmem_to_hbm [thread:$0]  (%p720_p9), %s333_s11, 96, %s335_s16, %s319_s19, %s649_s12, %s649_s12, %s650_s3  }
  0x8e PF: > { %s349_s24 = sand.u32 1, %s622_s13   ;;  %p452_p0 = pnand %p423_p12, %p727_p11 }
  0x8f   : > { %s350_s4 = scalar_lea.sflag [#allocation6], %s349_s24 }
  0x90   : > { %p453_p1 = pneg %p452_p0 }
  0x92   : > { %617 = dma.done.wait (%p453_p1), %s350_s4, 96  }
  0x93   : > { %619 = vsyncadd (%p453_p1), %s350_s4, 4294967200  ;;  %s26_s0 = sadd.s32 1, %s642_s0   ;;  %s822_s13 = smov %s626_s14 }
  0x94   : > { %p23_p2 = scmp.ge.s32.totalorder %s26_s0, 4   ;;  %s823_s14 = smov %s630_s15 }
  0x95   : > { %s824_s15 = smov %s725_s26  ;;  %s825_s16 = smov %s638_s17 }
  0x96   : > { %s826_s17 = smov %s828_s20  ;;  %25 = sbr.rel (!%p23_p2) target bundleno = 12 (0xc), region = 73 }
  0x9b   :  { %356 = vsyncpa [#allocation5], 1 }
  0x9c   :  { %358 = vsyncpa [#allocation5 + $0x1], 1 }
  0x9d   :  { %359 = vsyncpa [#allocation6], 1 }
  0x9e   :  { %361 = vsyncpa [#allocation6 + $0x1], 1 }

</bundles_post_ra>
